<compile_context>
chip_gen: v6e
topology: v6e:2x2x1
jax: 0.10.0
libtpu: 0.0.40
codegen_flags: <defaults>
</compile_context>

<pallas_src>
import jax
import jax.numpy as jnp
from jax.experimental import pallas as pl
from jax.experimental.pallas import tpu as pltpu


def _sigmoid(z):
    # Exact identity: sigmoid(z) = 0.5*(tanh(z/2)+1).  tanh goes to the EUP
    # slot; avoids an f32 divide (Newton iterations on the VPU) over the full
    # (net_width, block_b) activation.
    return 0.5 * (jnp.tanh(0.5 * z) + 1.0)


def critic_kernel(xt_ref, w1_ref, b1_ref, w2_ref, b2_ref, w3_ref, b3_ref, o_ref):
    # xt_ref: (state_dim, block_b)   batch on lanes (lane-dense)
    # w1_ref: (net_width, state_dim) PyTorch (out, in) layout
    # w2_ref: (net_width, net_width)
    # b1/b2/w3 refs: (net_width, 1) columns (broadcast along lanes)
    # b3_ref: (1, 1) scalar in SMEM
    h1 = jnp.dot(w1_ref[...], xt_ref[...], preferred_element_type=jnp.float32)
    h1 = _sigmoid(h1 + b1_ref[...])                        # (net_width, block_b)

    h2 = jnp.dot(w2_ref[...], h1, preferred_element_type=jnp.float32)
    h2 = _sigmoid(h2 + b2_ref[...])                        # (net_width, block_b)

    # Final layer output width is 1 -> VPU multiply + sublane (XLU) reduce,
    # no degenerate N=1 MXU matmul.
    v = jnp.sum(h2 * w3_ref[...], axis=0, keepdims=True)   # (1, block_b)
    o_ref[...] = (v + b3_ref[0, 0]).astype(o_ref.dtype)


def _round_up(x, m):
    return (x + m - 1) // m * m


def _vmem_plan():
    """Return (vmem_limit_bytes, tile_budget_bytes) sized per TPU generation."""
    try:
        cap = int(pltpu.get_tpu_info().vmem_capacity_bytes)
    except Exception:
        cap = 64 * 1024 * 1024           # conservative fallback = v7x per-core VMEM
    limit = min(int(cap * 0.9), 100 * 1024 * 1024)   # scoped limit we request
    budget = int(limit * 0.6)                        # headroom for compiler temps
    return limit, budget


def _choose_tiling(B, state_dim, net_width, vmem_budget_bytes):
    """Pick (block_b, num_tiles) for the batch (lane) axis.

    Per-tile VMEM (f32 = 4 B), with the input transposed to (state_dim, B):
      input  double-buffer : 2 * pad8(state_dim) * block_b
      output double-buffer : 2 * 8 * block_b
      activations / temps  : ~4 * pad8(net_width) * block_b   (h1, h2, temps)
    Resident weight/bias buffers (double-buffered by default, lanes pad to 128):
      2 * [nw8*pad128(state_dim) + nw8*pad128(net_width) + 3*nw8*128]
    """
    sd8 = _round_up(state_dim, 8)
    nw8 = _round_up(net_width, 8)
    per_col_bytes = 4 * (2 * sd8 + 2 * 8 + 4 * nw8)
    fixed_bytes = 4 * 2 * (nw8 * _round_up(state_dim, 128)
                           + nw8 * _round_up(net_width, 128)
                           + 3 * nw8 * 128)
    avail = max(vmem_budget_bytes - fixed_bytes, per_col_bytes * 128)
    max_block = (avail // per_col_bytes) // 128 * 128
    max_block = int(max(128, min(max_block, 65536)))

    b128 = _round_up(max(B, 1), 128)
    # Prefer >= 4 grid steps when the batch allows it: gives the pipeline tiles
    # to prefetch behind compute and lets the "parallel" axis use both v7x TCs.
    target_tiles = max(1, min(4, b128 // 128))
    num_tiles = max(pl.cdiv(b128, max_block), target_tiles)
    block_b = _round_up(pl.cdiv(B, num_tiles), 128)
    block_b = min(block_b, max_block)
    num_tiles = pl.cdiv(B, block_b)
    return block_b, num_tiles


def critic_forward(state, params, *, block_b=None):
    """Fused Critic forward.  state: (B, state_dim) f32 -> (B, 1) f32.

    params follow the PyTorch nn.Linear layout:
      w1 (net_width, state_dim), b1 (net_width,)
      w2 (net_width, net_width), b2 (net_width,)
      w3 (1, net_width),         b3 (1,)
    """
    B, state_dim = state.shape
    w1, b1 = params["w1"], params["b1"]
    w2, b2 = params["w2"], params["b2"]
    w3, b3 = params["w3"], params["b3"]
    net_width = w1.shape[0]

    vmem_limit, vmem_budget = _vmem_plan()
    if block_b is None:
        block_b, num_tiles = _choose_tiling(B, state_dim, net_width, vmem_budget)
    else:
        block_b = max(128, block_b // 128 * 128)
        num_tiles = pl.cdiv(B, block_b)

    # Single wrapper-side copy: feature-major layout so the streamed input
    # block is lane-dense.  No jnp.pad: Pallas masks the partial final tile
    # and garbage lanes past B stay in their own (dropped) columns.
    x_t = state.T                                           # (state_dim, B)

    # Tiny reshapes so biases / w3 broadcast along lanes inside the kernel.
    b1c = b1.reshape(net_width, 1)
    b2c = b2.reshape(net_width, 1)
    w3c = w3.reshape(net_width, 1)
    b3s = b3.reshape(1, 1)

    out = pl.pallas_call(
        critic_kernel,
        out_shape=jax.ShapeDtypeStruct((1, B), jnp.float32),
        grid_spec=pltpu.PrefetchScalarGridSpec(
            num_scalar_prefetch=0,
            grid=(num_tiles,),
            in_specs=[
                # state^T: tiled over the batch (lane) axis, lane-dense blocks
                pl.BlockSpec((state_dim, block_b), lambda i: (0, i)),
                # weights / biases: constant index_map -> resident across all
                # batch tiles (no re-DMA).  For very large net_width consider
                # pipeline_mode=pl.Buffered(1) to drop their double buffer.
                pl.BlockSpec((net_width, state_dim), lambda i: (0, 0)),
                pl.BlockSpec((net_width, 1), lambda i: (0, 0)),
                pl.BlockSpec((net_width, net_width), lambda i: (0, 0)),
                pl.BlockSpec((net_width, 1), lambda i: (0, 0)),
                pl.BlockSpec((net_width, 1), lambda i: (0, 0)),
                # b3: single scalar -> SMEM instead of a padded (8,128) VMEM tile
                pl.BlockSpec(memory_space=pltpu.MemorySpace.SMEM),
            ],
            # lane-dense (1, block_b) output slab -> full-width stores
            out_specs=pl.BlockSpec((1, block_b), lambda i: (0, i)),
        ),
        compiler_params=pltpu.CompilerParams(
            dimension_semantics=("parallel",),   # batch tiles shard across TCs
            vmem_limit_bytes=vmem_limit,
        ),
    )(x_t, w1, b1c, w2, b2c, w3c, b3s)

    # Back to the module's (B, 1) output layout.
    return out.reshape(B, 1)


def init_critic_params(key, state_dim, net_width):
    """Deterministic synthetic init (PyTorch-like uniform fan-in scaling),
    stored in native PyTorch nn.Linear (out, in) layout."""
    ks = jax.random.split(key, 6)

    def uniform(k, shape, fan_in):
        bound = 1.0 / (fan_in ** 0.5)
        return jax.random.uniform(k, shape, jnp.float32, -bound, bound)

    return {
        "w1": uniform(ks[0], (net_width, state_dim), state_dim),
        "b1": uniform(ks[1], (net_width,), state_dim),
        "w2": uniform(ks[2], (net_width, net_width), net_width),
        "b2": uniform(ks[3], (net_width,), net_width),
        "w3": uniform(ks[4], (1, net_width), net_width),
        "b3": uniform(ks[5], (1,), net_width),
    }


def critic_reference(state, params):
    """Pure-JAX reference matching the PyTorch module (y = x @ W^T + b)."""
    h1 = jax.nn.sigmoid(state @ params["w1"].T + params["b1"])
    h2 = jax.nn.sigmoid(h1 @ params["w2"].T + params["b2"])
    return h2 @ params["w3"].T + params["b3"]


if __name__ == "__main__":
    key = jax.random.PRNGKey(0)
    k_param, k_state = jax.random.split(key)

    batch = 8
    state_dim = 16
    net_width = 32

    params = init_critic_params(k_param, state_dim, net_width)
    state = jax.random.normal(k_state, (batch, state_dim), dtype=jnp.float32)

    v = critic_forward(state, params)
    v = jax.block_until_ready(v)

    v_ref = critic_reference(state, params)
    assert v.shape == (batch, 1)
    assert jnp.allclose(v, v_ref, atol=1e-5, rtol=1e-5)

    print("KERNEL_OK")
</pallas_src>

<mosaic_0001>
module attributes {stable_mosaic.version = 11 : i64} {
  func.func @critic_kernel(%arg0: i32, %arg1: memref<16x128xf32, #tpu.memory_space<vmem>>, %arg2: memref<32x16xf32, #tpu.memory_space<vmem>>, %arg3: memref<32x1xf32, #tpu.memory_space<vmem>>, %arg4: memref<32x32xf32, #tpu.memory_space<vmem>>, %arg5: memref<32x1xf32, #tpu.memory_space<vmem>>, %arg6: memref<32x1xf32, #tpu.memory_space<vmem>>, %arg7: memref<1x1xf32, #tpu.memory_space<smem>>, %arg8: memref<1x128xf32, #tpu.memory_space<vmem>>) attributes {dimension_semantics = [#tpu.dimension_semantics<parallel>], iteration_bounds = array<i64: 1>, scalar_prefetch = 0 : i64, scratch_operands = 0 : i64, tpu.core_type = #tpu.core_type<tc>, window_params = [{transform_indices = @transform_0, window_bounds = array<i64: 16, 128>}, {pipeline_mode = #tpu.pipeline_mode<synchronous>, transform_indices = @transform_1, window_bounds = array<i64: 32, 16>}, {pipeline_mode = #tpu.pipeline_mode<synchronous>, transform_indices = @transform_2, window_bounds = array<i64: 32, 1>}, {pipeline_mode = #tpu.pipeline_mode<synchronous>, transform_indices = @transform_3, window_bounds = array<i64: 32, 32>}, {pipeline_mode = #tpu.pipeline_mode<synchronous>, transform_indices = @transform_4, window_bounds = array<i64: 32, 1>}, {pipeline_mode = #tpu.pipeline_mode<synchronous>, transform_indices = @transform_5, window_bounds = array<i64: 32, 1>}, {transform_indices = @transform_6, window_bounds = array<i64: 1, 1>}, {transform_indices = @transform_7, window_bounds = array<i64: 1, 128>}]} {
    %c0 = arith.constant 0 : index
    %c0_0 = arith.constant 0 : index
    %0 = vector.load %arg2[%c0, %c0_0] : memref<32x16xf32, #tpu.memory_space<vmem>>, vector<32x16xf32>
    %c0_1 = arith.constant 0 : index
    %c0_2 = arith.constant 0 : index
    %1 = vector.load %arg1[%c0_1, %c0_2] : memref<16x128xf32, #tpu.memory_space<vmem>>, vector<16x128xf32>
    %cst = arith.constant dense<0.000000e+00> : vector<32x128xf32>
    %2 = tpu.matmul %0, %1, %cst {dimension_numbers = #tpu.dot_dimension_numbers<[1], [0], [0], [1], [0, 0, 1, 1], [], []>} : vector<32x16xf32>, vector<16x128xf32>, vector<32x128xf32> -> vector<32x128xf32>
    %c0_3 = arith.constant 0 : index
    %c0_4 = arith.constant 0 : index
    %3 = vector.load %arg3[%c0_3, %c0_4] : memref<32x1xf32, #tpu.memory_space<vmem>>, vector<32x1xf32>
    %4 = vector.broadcast %3 : vector<32x1xf32> to vector<32x128xf32>
    %5 = arith.addf %2, %4 : vector<32x128xf32>
    %cst_5 = arith.constant 5.000000e-01 : f32
    %6 = vector.broadcast %cst_5 : f32 to vector<32x128xf32>
    %7 = arith.mulf %6, %5 : vector<32x128xf32>
    %8 = math.tanh %7 : vector<32x128xf32>
    %cst_6 = arith.constant 1.000000e+00 : f32
    %9 = vector.broadcast %cst_6 : f32 to vector<32x128xf32>
    %10 = arith.addf %8, %9 : vector<32x128xf32>
    %cst_7 = arith.constant 5.000000e-01 : f32
    %11 = vector.broadcast %cst_7 : f32 to vector<32x128xf32>
    %12 = arith.mulf %11, %10 : vector<32x128xf32>
    %c0_8 = arith.constant 0 : index
    %c0_9 = arith.constant 0 : index
    %13 = vector.load %arg4[%c0_8, %c0_9] : memref<32x32xf32, #tpu.memory_space<vmem>>, vector<32x32xf32>
    %cst_10 = arith.constant dense<0.000000e+00> : vector<32x128xf32>
    %14 = tpu.matmul %13, %12, %cst_10 {dimension_numbers = #tpu.dot_dimension_numbers<[1], [0], [0], [1], [0, 0, 1, 1], [], []>} : vector<32x32xf32>, vector<32x128xf32>, vector<32x128xf32> -> vector<32x128xf32>
    %c0_11 = arith.constant 0 : index
    %c0_12 = arith.constant 0 : index
    %15 = vector.load %arg5[%c0_11, %c0_12] : memref<32x1xf32, #tpu.memory_space<vmem>>, vector<32x1xf32>
    %16 = vector.broadcast %15 : vector<32x1xf32> to vector<32x128xf32>
    %17 = arith.addf %14, %16 : vector<32x128xf32>
    %cst_13 = arith.constant 5.000000e-01 : f32
    %18 = vector.broadcast %cst_13 : f32 to vector<32x128xf32>
    %19 = arith.mulf %18, %17 : vector<32x128xf32>
    %20 = math.tanh %19 : vector<32x128xf32>
    %cst_14 = arith.constant 1.000000e+00 : f32
    %21 = vector.broadcast %cst_14 : f32 to vector<32x128xf32>
    %22 = arith.addf %20, %21 : vector<32x128xf32>
    %cst_15 = arith.constant 5.000000e-01 : f32
    %23 = vector.broadcast %cst_15 : f32 to vector<32x128xf32>
    %24 = arith.mulf %23, %22 : vector<32x128xf32>
    %c0_16 = arith.constant 0 : index
    %c0_17 = arith.constant 0 : index
    %25 = vector.load %arg6[%c0_16, %c0_17] : memref<32x1xf32, #tpu.memory_space<vmem>>, vector<32x1xf32>
    %26 = vector.broadcast %25 : vector<32x1xf32> to vector<32x128xf32>
    %27 = arith.mulf %24, %26 : vector<32x128xf32>
    %cst_18 = arith.constant dense<0.000000e+00> : vector<128xf32>
    %28 = vector.multi_reduction <add>, %27, %cst_18 [0] : vector<32x128xf32> to vector<128xf32>
    %29 = vector.shape_cast %28 : vector<128xf32> to vector<1x128xf32>
    %c0_19 = arith.constant 0 : index
    %c0_20 = arith.constant 0 : index
    %30 = memref.load %arg7[%c0_19, %c0_20] : memref<1x1xf32, #tpu.memory_space<smem>>
    %31 = vector.broadcast %30 : f32 to vector<1x128xf32>
    %32 = arith.addf %29, %31 : vector<1x128xf32>
    %c0_21 = arith.constant 0 : index
    %c0_22 = arith.constant 0 : index
    %33 = vector.load %arg8[%c0_21, %c0_22] : memref<1x128xf32, #tpu.memory_space<vmem>>, vector<1x128xf32>
    tpu.vector_store %arg8[%c0_21, %c0_22], %32 {strides = array<i32>} : memref<1x128xf32, #tpu.memory_space<vmem>>, vector<1x128xf32>,
    return
  }
  func.func @transform_0(%arg0: i32) -> (i32, i32) {
    %c0_i32 = arith.constant 0 : i32
    %c0_i32_0 = arith.constant 0 : i32
    return %c0_i32, %arg0 : i32, i32
  }
  func.func @transform_1(%arg0: i32) -> (i32, i32) {
    %c0_i32 = arith.constant 0 : i32
    %c0_i32_0 = arith.constant 0 : i32
    %c0_i32_1 = arith.constant 0 : i32
    return %c0_i32, %c0_i32_0 : i32, i32
  }
  func.func @transform_2(%arg0: i32) -> (i32, i32) {
    %c0_i32 = arith.constant 0 : i32
    %c0_i32_0 = arith.constant 0 : i32
    %c0_i32_1 = arith.constant 0 : i32
    return %c0_i32, %c0_i32_0 : i32, i32
  }
  func.func @transform_3(%arg0: i32) -> (i32, i32) {
    %c0_i32 = arith.constant 0 : i32
    %c0_i32_0 = arith.constant 0 : i32
    %c0_i32_1 = arith.constant 0 : i32
    return %c0_i32, %c0_i32_0 : i32, i32
  }
  func.func @transform_4(%arg0: i32) -> (i32, i32) {
    %c0_i32 = arith.constant 0 : i32
    %c0_i32_0 = arith.constant 0 : i32
    %c0_i32_1 = arith.constant 0 : i32
    return %c0_i32, %c0_i32_0 : i32, i32
  }
  func.func @transform_5(%arg0: i32) -> (i32, i32) {
    %c0_i32 = arith.constant 0 : i32
    %c0_i32_0 = arith.constant 0 : i32
    %c0_i32_1 = arith.constant 0 : i32
    return %c0_i32, %c0_i32_0 : i32, i32
  }
  func.func @transform_6(%arg0: i32) -> (i32, i32) {
    %c0_i32 = arith.constant 0 : i32
    %c0_i32_0 = arith.constant 0 : i32
    %c0_i32_1 = arith.constant 0 : i32
    return %c0_i32, %c0_i32_0 : i32, i32
  }
  func.func @transform_7(%arg0: i32) -> (i32, i32) {
    %c0_i32 = arith.constant 0 : i32
    %c0_i32_0 = arith.constant 0 : i32
    return %c0_i32, %arg0 : i32, i32
  }
}

</mosaic_0001>

<bundles_post_ra>
// kernel: tpu_custom_call.1
= control target key start
LH: loop header
LB: loop body
LE: loop exit
PB: predicated region body
PF: predicated region fallthrough
CT: control target
= control target key end

     0   :  { %vm58_vm0 = vcmask 130048   ;;  %v457_v4 = vmov 0   ;;  %s579_s0 = inlined_call_operand.vmem [shape: f32[16,8], index: 0, kind: input, shape index: {}]   ;;  %s580_s1 = inlined_call_operand.vmem [shape: f32[32,16], index: 1, kind: input, shape index: {}]   ;;  %s581_s2 = inlined_call_operand.vmem [shape: f32[32,1], index: 2, kind: input, shape index: {}]   ;;  %s582_s3 = inlined_call_operand.vmem [shape: f32[32,32], index: 3, kind: input, shape index: {}]   ;;  %s583_s4 = inlined_call_operand.vmem [shape: f32[32,1], index: 4, kind: input, shape index: {}]   ;;  %s584_s5 = inlined_call_operand.vmem [shape: f32[32,1], index: 5, kind: input, shape index: {}]   ;;  %s585_s6 = inlined_call_operand.<no memory space> [shape: f32[1,1], index: 6, kind: input, shape index: {}]   ;;  %s586_s7 = inlined_call_operand.hbm [shape: f32[1,8], index: 7, kind: output, shape index: {}]  }
   0x1   :  { %v33_v0 = vld [vmem:[%s579_s0 + $0x8] sm:$0xff]  ;;  %v32_v1 = vld [vmem:[%s579_s0] sm:$0xff]  ;;  %417 = vset.pattern.permute.xlu0 %v457_v4  ;;  %v37_v5 = vld [vmem:[%s581_s2 + $0x18] sm:$0xff]  ;;  %418 = vset.pattern.permute.xlu1 %v457_v4 }
   0x2   :  { %v28_v2 = vld [vmem:[%s580_s1] sm:$0xff]  ;;  %391 = vmatprep.subr.mxu0 %v33_v0  ;;  %v29_v3 = vld [vmem:[%s580_s1 + $0x8] sm:$0xff]  ;;  %v30_v7 = vld [vmem:[%s580_s1 + $0x10] sm:$0xff]  ;;  %55 = vperm.xlu0 %417, %v37_v5  }
   0x3   :  { %395 = vmatprep.mubr.msk.f32.mxu0 %vm58_vm0, %v28_v2  ;;  %392 = vmatpush3.msra.mxu0 %v33_v0  ;;  %v35_v6 = vld [vmem:[%s581_s2 + $0x8] sm:$0xff]  ;;  %v36_v8 = vld [vmem:[%s581_s2 + $0x10] sm:$0xff]  ;;  %v31_v9 = vld [vmem:[%s580_s1 + $0x18] sm:$0xff] }
   0x4   :  { %393 = vmatprep.subr.mxu0 %v32_v1  ;;  %45 = vperm.xlu1 %418, %v35_v6   ;;  %v34_v10 = vld [vmem:[%s581_s2] sm:$0xff] }
   0x5   :  { %394 = vmatpush3.msra.mxu0 %v32_v1 }
   0x6   :  { %396 = vmatmul.mubr.msk.f32.vlgmr.msra.gmra.mxu0 %vm58_vm0, %v29_v3 }
   0x7   :  { %398 = vmatprep.mubr.msk.f32.mxu0 %vm58_vm0, %v30_v7 }
   0x8   :  { %13 = vsyncpa [#allocation4], 0  ;;  %50 = vperm.xlu0 %417, %v36_v8   ;;  %v176_v11 = vld [vmem:[%s583_s4] sm:$0xff]  ;;  %40 = vperm.xlu1 %418, %v34_v10   ;;  %v177_v12 = vld [vmem:[%s583_s4 + $0x8] sm:$0xff]  ;;  %vm200_vm1 = vcmask 261120   ;;  %s458_s17 = smov [#allocation3]  }
   0x9   :  { %v178_v13 = vld [vmem:[%s583_s4 + $0x10] sm:$0xff]  ;;  %v179_v14 = vld [vmem:[%s583_s4 + $0x18] sm:$0xff]  ;;  %v314_v15 = vld [vmem:[%s584_s5] sm:$0xff]  ;;  %s361_s18 = sshll.u32 %s458_s17, 4  ;;  %s362_s18 = int_to_ptr.vmem [resolvable:$true] %s361_s18 }
   0xa   :  { %399 = vmatmul.mubr.msk.f32.gmra.mxu0 %vm58_vm0, %v31_v9  ;;  %v315_v16 = vld [vmem:[%s584_s5 + $0x8] sm:$0xff]  ;;  %v316_v17 = vld [vmem:[%s584_s5 + $0x10] sm:$0xff]  ;;  %v317_v18 = vld [vmem:[%s584_s5 + $0x18] sm:$0xff]  ;;  %s435_s19 = scalar_lea.vmem %s362_s18, 16  ;;  %s439_s20 = scalar_lea.vmem %s362_s18, 32 }
   0xb   :  { %v172_v19 = vld [vmem:[%s582_s3] sm:$0xff]  ;;  %v173_v48 = vld [vmem:[%s582_s3 + $0x8] sm:$0xff]  ;;  %v174_v49 = vld [vmem:[%s582_s3 + $0x10] sm:$0xff]  ;;  %p436_p0 = scmp.ne.s32.totalorder %s362_s18, %s435_s19  ;;  %p440_p1 = scmp.lt.s32.totalorder %s362_s18, %s362_s18 }
   0xc   :  { %182 = vperm.xlu0 %417, %v176_v11   ;;  %187 = vperm.xlu1 %418, %v177_v12   ;;  %v175_v50 = vld [vmem:[%s582_s3 + $0x18] sm:$0xff]  ;;  %p441_p2 = scmp.lt.s32.totalorder %s439_s20, %s435_s19 }
   0xd   :  { %409 = vmatprep.mubr.msk.f32.mxu1 %vm200_vm1, %v172_v19 }
   0xe   :  { %p442_p3 = por %p441_p2, %p440_p1 }
  0x10   :  { %192 = vperm.xlu0 %417, %v178_v13   ;;  %197 = vperm.xlu1 %418, %v179_v14   ;;  %p443_p4 = pnand %p442_p3, %p436_p0 }
  0x14   :  { %320 = vperm.xlu0 %417, %v314_v15   ;;  %325 = vperm.xlu1 %418, %v315_v16  }
  0x18   :  { %330 = vperm.xlu0 %417, %v316_v17   ;;  %335 = vperm.xlu1 %418, %v317_v18  }
  0x7d   :  { %v56_v21 = vpop.permute.xlu0 %55 }
  0x7f   :  { %v46_v20 = vpop.permute.xlu1 %45 }
  0x83   :  { %v41_v24 = vpop.permute.xlu1 %40  ;;  %v51_v30 = vpop.permute.xlu0 %50 }
  0x87   :  { %v188_v51 = vpop.permute.xlu1 %187  ;;  %v183_v52 = vpop.permute.xlu0 %182 }
  0x8b   :  { %v198_v58 = vpop.permute.xlu1 %197  ;;  %v193_v62 = vpop.permute.xlu0 %192 }
  0x8f   :  { %v321_v8 = vpop.permute.xlu0 %320  ;;  %v326_v13 = vpop.permute.xlu1 %325 }
  0x93   :  { %v331_v19 = vpop.permute.xlu0 %330 }
  0xc6   :  { %v397_v22 = vpop.f32.mrf.mxu0 }
  0xc7   :  { %v143_v23 = vadd.f32 %v397_v22, %v46_v20  ;;  %v336_v22 = vpop.permute.xlu1 %335 }
  0xc8   :  { %v137_v25 = vpop.f32.mrf.mxu0 }
  0xc9   :  { %v138_v26 = vadd.f32 %v137_v25, %v41_v24  ;;  %v157_v27 = vmul.f32 0.5, %v143_v23 }
  0xca   :  { %v400_v28 = vpop.f32.mrf.mxu0 }
  0xcb   :  { %v153_v29 = vadd.f32 %v400_v28, %v56_v21  ;;  %v156_v31 = vmul.f32 0.5, %v138_v26  ;;  %419 = vtanh.f32 %v157_v27 }
  0xcc   :  { %v147_v32 = vpop.f32.mrf.mxu0 }
  0xcd   :  { %v159_v33 = vmul.f32 0.5, %v153_v29  ;;  %v148_v34 = vadd.f32 %v147_v32, %v51_v30 }
  0xcf   :  { %421 = vtanh.f32 %v159_v33  ;;  %v158_v35 = vmul.f32 0.5, %v148_v34 }
  0xd0   :  { %423 = vtanh.f32 %v156_v31  ;;  %v352_v31 = vstv %s585_s6 }
  0xd1   :  { %425 = vtanh.f32 %v158_v35 }
  0xd8   :  { %v420_v36 = vpop.eup %419 }
  0xd9   :  { %v165_v43 = vadd.f32 1.0, %v420_v36 }
  0xdb   :  { %v169_v46 = vmul.f32 0.5, %v165_v43 }
  0xdc   :  { %v422_v37 = vpop.eup %421 }
  0xdd   :  { %v424_v38 = vpop.eup %423  ;;  %v167_v39 = vadd.f32 1.0, %v422_v37 }
  0xde   :  { %v426_v40 = vpop.eup %425  ;;  %v164_v45 = vadd.f32 1.0, %v424_v38 }
  0xdf   :  { %v171_v41 = vmul.f32 0.5, %v167_v39  ;;  %v166_v42 = vadd.f32 1.0, %v426_v40 }
  0xe0   :  { %v168_v47 = vmul.f32 0.5, %v164_v45 }
  0xe1   :  { %401 = vmatprep.subr.mxu1 %v171_v41  ;;  %v170_v44 = vmul.f32 0.5, %v166_v42 }
  0xe2   :  { %402 = vmatpush3.msra.mxu1 %v171_v41 }
  0xe3   :  { %403 = vmatprep.subr.mxu1 %v170_v44 }
  0xe4   :  { %404 = vmatpush3.msra.mxu1 %v170_v44 }
  0xe5   :  { %405 = vmatprep.subr.mxu1 %v169_v46 }
  0xe6   :  { %406 = vmatpush3.msra.mxu1 %v169_v46 }
  0xe7   :  { %407 = vmatprep.subr.mxu1 %v168_v47 }
  0xe8   :  { %408 = vmatpush3.msra.mxu1 %v168_v47 }
  0xe9   :  { %410 = vmatmul.mubr.msk.f32.vlgmr.msra.gmra.mxu1 %vm200_vm1, %v173_v48 }
  0xea   :  { %412 = vmatprep.mubr.msk.f32.mxu1 %vm200_vm1, %v174_v49 }
  0xed   :  { %413 = vmatmul.mubr.msk.f32.gmra.mxu1 %vm200_vm1, %v175_v50 }
 0x1a9   :  { %v411_v53 = vpop.f32.mrf.mxu1 }
 0x1aa   :  { %v285_v54 = vadd.f32 %v411_v53, %v188_v51 }
 0x1ab   :  { %v279_v55 = vpop.f32.mrf.mxu1 }
 0x1ac   :  { %v299_v56 = vmul.f32 0.5, %v285_v54  ;;  %v280_v57 = vadd.f32 %v279_v55, %v183_v52 }
 0x1ad   :  { %v414_v59 = vpop.f32.mrf.mxu1 }
 0x1ae   :  { %427 = vtanh.f32 %v299_v56  ;;  %v298_v60 = vmul.f32 0.5, %v280_v57  ;;  %v295_v61 = vadd.f32 %v414_v59, %v198_v58 }
 0x1af   :  { %v289_v63 = vpop.f32.mrf.mxu1 }
 0x1b0   :  { %429 = vtanh.f32 %v298_v60  ;;  %v301_v0 = vmul.f32 0.5, %v295_v61  ;;  %v290_v1 = vadd.f32 %v289_v63, %v193_v62 }
 0x1b2   :  { %431 = vtanh.f32 %v301_v0  ;;  %v300_v2 = vmul.f32 0.5, %v290_v1 }
 0x1b4   :  { %433 = vtanh.f32 %v300_v2 }
 0x1bb   :  { %v428_v3 = vpop.eup %427 }
 0x1bc   :  { %v307_v4 = vadd.f32 1.0, %v428_v3 }
 0x1bd   :  { %v430_v5 = vpop.eup %429 }
 0x1be   :  { %v306_v6 = vadd.f32 1.0, %v430_v5  ;;  %v311_v9 = vmul.f32 0.5, %v307_v4 }
 0x1bf   :  { %v432_v7 = vpop.eup %431 }
 0x1c0   :  { %v310_v10 = vmul.f32 0.5, %v306_v6  ;;  %v309_v11 = vadd.f32 1.0, %v432_v7  ;;  %v339_v16 = vmul.f32 %v326_v13, %v311_v9 }
 0x1c1   :  { %v434_v12 = vpop.eup %433 }
 0x1c2   :  { %v338_v14 = vmul.f32 %v321_v8, %v310_v10  ;;  %v308_v15 = vadd.f32 1.0, %v434_v12  ;;  %v313_v17 = vmul.f32 0.5, %v309_v11 }
 0x1c4   :  { %v312_v18 = vmul.f32 0.5, %v308_v15  ;;  %v342_v20 = vadd.f32 %v339_v16, %v338_v14  ;;  %v341_v23 = vmul.f32 %v336_v22, %v313_v17 }
 0x1c6   :  { %v340_v21 = vmul.f32 %v331_v19, %v312_v18 }
 0x1c8   :  { %v343_v24 = vadd.f32 %v342_v20, %v340_v21 }
 0x1ca   :  { %v344_v25 = vadd.f32 %v343_v24, %v341_v23 }
 0x1cc   :  { %v345_v26 = vrot.slane %v344_v25, 4 }
 0x1ce   :  { %v346_v27 = vadd.f32 %v345_v26, %v344_v25 }
 0x1d0   :  { %v347_v28 = vrot.slane %v346_v27, 2 }
 0x1d2   :  { %v348_v29 = vadd.f32 %v347_v28, %v346_v27 }
 0x1d4   :  { %v349_v30 = vrot.slane %v348_v29, 1 }
 0x1d6   :  { %v350_v32 = vadd.f32 %v349_v30, %v348_v29 }
 0x1d8   :  { %v353_v33 = vadd.f32 %v352_v31, %v350_v32 }
 0x1da   :  { %354 = vst [vmem:[#allocation3] sm:$0x1] %v353_v33 }
 0x1db   :  { %446 = shalt.err (!%p443_p4)
}
 0x1dc   :  { %364 = dma.vmem_to_hbm [thread:$0]  %s362_s18, 16, %s586_s7, [#allocation4]  }
 0x1dd   :  { %455 = dma.done.wait [#allocation4], 16  }
 0x1de   :  { %456 = vsyncadd [#allocation4], 4294967280 }
 0x1df   :  { %368 = vsyncpa [#allocation4], 1 }

</bundles_post_ra>
